<compile_context>
chip_gen: v6e
topology: v6e:2x2x1
jax: 0.10.0
libtpu: 0.0.40
codegen_flags: <defaults>
</compile_context>

<pallas_src>
import functools

import jax
import jax.numpy as jnp
from jax.experimental import pallas as pl
from jax.experimental.pallas import tpu as pltpu


def _round_up(a: int, m: int) -> int:
    return (a + m - 1) // m * m


def _classifier_kernel(x_ref, w1_ref, b1_ref, w2_ref, b2_ref, o_ref):
    # Cast the activation tile to the weight dtype inside the kernel — avoids
    # a separate wrapper-side astype pass over x in HBM.
    x = x_ref[...].astype(w1_ref.dtype)

    # --- feature extractor: Linear + ReLU (MXU matmul, f32 accumulate) ---
    h = jnp.dot(x, w1_ref[...], preferred_element_type=jnp.float32)
    h = jnp.maximum(h + b1_ref[...], 0.0)          # bias-add + ReLU in f32

    # --- dropout(p=0.2): identity in eval mode ---

    # --- LogReg head: Linear ---
    out = jnp.dot(h.astype(w2_ref.dtype), w2_ref[...],
                  preferred_element_type=jnp.float32)
    o_ref[...] = (out + b2_ref[...]).astype(o_ref.dtype)


@functools.partial(jax.jit, static_argnames=("use_bf16", "tm", "tc_parallel"))
def simple_classifier_forward(x, w1, b1, w2, b2, *, use_bf16=True, tm=8192,
                              tc_parallel=False):
    """x: (B, n_in); w1: (n_in, n_h); b1: (n_h,) or (1, n_h);
    w2: (n_h, nb_classes); b2: (nb_classes,) or (1, nb_classes).
    Weights must be pre-transposed to (in_features, out_features) — raw
    PyTorch Linear weights are (out, in) and would be silently wrong."""
    B, n_in = x.shape
    n_in_w, n_h = w1.shape
    n_h_w, n_cls = w2.shape
    assert n_in_w == n_in and n_h_w == n_h, (
        "weights must be (in_features, out_features); got "
        f"w1={w1.shape}, w2={w2.shape} for x={x.shape}")

    b1 = jnp.asarray(b1, jnp.float32).reshape(1, n_h)
    b2 = jnp.asarray(b2, jnp.float32).reshape(1, n_cls)

    # Lane-dense hidden dim: zero-pad n_h to a multiple of 128. Exact:
    # relu(0 + 0) = 0, and the zero rows of w2 contribute nothing.
    n_h_p = _round_up(n_h, 128)
    if n_h_p != n_h:
        w1 = jnp.pad(w1, ((0, 0), (0, n_h_p - n_h)))
        b1 = jnp.pad(b1, ((0, 0), (0, n_h_p - n_h)))
        w2 = jnp.pad(w2, ((0, n_h_p - n_h), (0, 0)))

    # Weights -> bf16 (tiny, one-time cast; VMEM-resident). x is NOT cast or
    # padded in the wrapper — it is read once from HBM in its native dtype.
    w_dtype = jnp.bfloat16 if use_bf16 else jnp.float32
    w1 = w1.astype(w_dtype)
    w2 = w2.astype(w_dtype)

    # Batch tiling: big tiles, no batch padding; ragged last block is clamped
    # by Pallas and out-of-bounds rows are never written (no row reductions).
    tile_m = min(tm, _round_up(B, 8))
    grid_b = pl.cdiv(B, tile_m)

    batch_sem = pltpu.CORE_PARALLEL if tc_parallel else pltpu.PARALLEL

    out = pl.pallas_call(
        _classifier_kernel,
        out_shape=jax.ShapeDtypeStruct((B, n_cls), jnp.float32),
        grid_spec=pltpu.PrefetchScalarGridSpec(
            num_scalar_prefetch=0,
            grid=(grid_b,),
            in_specs=[
                # x: one batch tile per grid step (double-buffered by Pallas).
                # If input DMA is exposed on v6e, add pipeline_mode=pl.Buffered(3).
                pl.BlockSpec((tile_m, n_in), lambda i: (i, 0)),
                # weights/biases: constant index_map -> VMEM-resident across steps
                pl.BlockSpec((n_in, n_h_p), lambda i: (0, 0)),
                pl.BlockSpec((1, n_h_p), lambda i: (0, 0)),
                pl.BlockSpec((n_h_p, n_cls), lambda i: (0, 0)),
                pl.BlockSpec((1, n_cls), lambda i: (0, 0)),
            ],
            # Unpadded, contiguous output stream: last dim = full array dim.
            out_specs=pl.BlockSpec((tile_m, n_cls), lambda i: (i, 0)),
        ),
        compiler_params=pltpu.CompilerParams(
            # Batch tiles are independent. CORE_PARALLEL (tc_parallel=True)
            # splits them across v7x's two TensorCores; PARALLEL is the safe
            # default for single-TC v5e/v6e and tiny grids.
            dimension_semantics=(batch_sem,),
            # VMEM budget @ tm=8192: x f32 tile 1 MiB + out 256 KiB, double-
            # buffered -> < 3 MiB total; fits v5e's 16 MiB scoped default.
            # Re-budget (vmem_limit_bytes) only if feature dims or tm grow.
        ),
    )(x, w1, b1, w2, b2)

    return out


def _reference(x, w1, b1, w2, b2):
    h = jnp.maximum(x @ w1 + b1, 0.0)
    return h @ w2 + b2


if __name__ == "__main__":
    # Small shapes consistent with the module: n_in=32, n_h=64, nb_classes=8.
    B, n_in, n_h, nb_classes = 8, 32, 64, 8

    key = jax.random.PRNGKey(0)
    kx, k1, k2, k3, k4 = jax.random.split(key, 5)

    x = jax.random.normal(kx, (B, n_in), dtype=jnp.float32)

    # Deterministic (xavier-like) parameter init, pre-transposed to (in, out).
    w1 = jax.random.normal(k1, (n_in, n_h), dtype=jnp.float32) * (1.0 / jnp.sqrt(n_in))
    b1 = jax.random.normal(k2, (1, n_h), dtype=jnp.float32) * 0.01
    w2 = jax.random.normal(k3, (n_h, nb_classes), dtype=jnp.float32) * (1.0 / jnp.sqrt(n_h))
    b2 = jax.random.normal(k4, (1, nb_classes), dtype=jnp.float32) * 0.01

    ref = _reference(x, w1, b1, w2, b2)

    # f32 path: exact-precision check against the reference.
    out_f32 = jax.block_until_ready(
        simple_classifier_forward(x, w1, b1, w2, b2, use_bf16=False))
    assert out_f32.shape == (B, nb_classes)
    assert jnp.allclose(out_f32, ref, atol=1e-5, rtol=1e-5), "f32 mismatch vs reference"

    # bf16-weight path (default): ~1e-2-level relative error expected.
    out_bf16 = jax.block_until_ready(
        simple_classifier_forward(x, w1, b1, w2, b2, use_bf16=True))
    assert out_bf16.shape == (B, nb_classes)
    assert jnp.allclose(out_bf16, ref, atol=1e-1, rtol=1e-1), "bf16 mismatch vs reference"

    # Multi-step grid with a ragged last block (exercises cdiv tiling, no pad).
    B2 = 200
    x2 = jax.random.normal(kx, (B2, n_in), dtype=jnp.float32)
    ref2 = _reference(x2, w1, b1, w2, b2)
    out2 = jax.block_until_ready(
        simple_classifier_forward(x2, w1, b1, w2, b2, use_bf16=False, tm=64))
    assert out2.shape == (B2, nb_classes)
    assert jnp.allclose(out2, ref2, atol=1e-5, rtol=1e-5), "ragged-grid mismatch"

    print("KERNEL_OK")
</pallas_src>

<mosaic_0001>
module attributes {stable_mosaic.version = 11 : i64} {
  func.func @_classifier_kernel(%arg0: i32, %arg1: memref<8x32xf32, #tpu.memory_space<vmem>>, %arg2: memref<32x128xf32, #tpu.memory_space<vmem>>, %arg3: memref<1x128xf32, #tpu.memory_space<vmem>>, %arg4: memref<128x8xf32, #tpu.memory_space<vmem>>, %arg5: memref<1x8xf32, #tpu.memory_space<vmem>>, %arg6: memref<8x8xf32, #tpu.memory_space<vmem>>) attributes {dimension_semantics = [#tpu.dimension_semantics<parallel>], iteration_bounds = array<i64: 1>, scalar_prefetch = 0 : i64, scratch_operands = 0 : i64, tpu.core_type = #tpu.core_type<tc>, window_params = [{transform_indices = @transform_0, window_bounds = array<i64: 8, 32>}, {pipeline_mode = #tpu.pipeline_mode<synchronous>, transform_indices = @transform_1, window_bounds = array<i64: 32, 128>}, {pipeline_mode = #tpu.pipeline_mode<synchronous>, transform_indices = @transform_2, window_bounds = array<i64: 1, 128>}, {pipeline_mode = #tpu.pipeline_mode<synchronous>, transform_indices = @transform_3, window_bounds = array<i64: 128, 8>}, {pipeline_mode = #tpu.pipeline_mode<synchronous>, transform_indices = @transform_4, window_bounds = array<i64: 1, 8>}, {transform_indices = @transform_5, window_bounds = array<i64: 8, 8>}]} {
    %c0 = arith.constant 0 : index
    %c0_0 = arith.constant 0 : index
    %0 = vector.load %arg1[%c0, %c0_0] : memref<8x32xf32, #tpu.memory_space<vmem>>, vector<8x32xf32>
    %c0_1 = arith.constant 0 : index
    %c0_2 = arith.constant 0 : index
    %1 = vector.load %arg2[%c0_1, %c0_2] : memref<32x128xf32, #tpu.memory_space<vmem>>, vector<32x128xf32>
    %cst = arith.constant dense<0.000000e+00> : vector<8x128xf32>
    %2 = tpu.matmul %0, %1, %cst {dimension_numbers = #tpu.dot_dimension_numbers<[1], [0], [0], [1], [0, 0, 1, 1], [], []>} : vector<8x32xf32>, vector<32x128xf32>, vector<8x128xf32> -> vector<8x128xf32>
    %c0_3 = arith.constant 0 : index
    %c0_4 = arith.constant 0 : index
    %3 = vector.load %arg3[%c0_3, %c0_4] : memref<1x128xf32, #tpu.memory_space<vmem>>, vector<1x128xf32>
    %4 = vector.broadcast %3 : vector<1x128xf32> to vector<8x128xf32>
    %5 = arith.addf %2, %4 : vector<8x128xf32>
    %cst_5 = arith.constant 0.000000e+00 : f32
    %6 = vector.broadcast %cst_5 : f32 to vector<8x128xf32>
    %7 = arith.maximumf %5, %6 : vector<8x128xf32>
    %c0_6 = arith.constant 0 : index
    %c0_7 = arith.constant 0 : index
    %8 = vector.load %arg4[%c0_6, %c0_7] : memref<128x8xf32, #tpu.memory_space<vmem>>, vector<128x8xf32>
    %cst_8 = arith.constant dense<0.000000e+00> : vector<8x8xf32>
    %9 = tpu.matmul %7, %8, %cst_8 {dimension_numbers = #tpu.dot_dimension_numbers<[1], [0], [0], [1], [0, 0, 1, 1], [], []>} : vector<8x128xf32>, vector<128x8xf32>, vector<8x8xf32> -> vector<8x8xf32>
    %c0_9 = arith.constant 0 : index
    %c0_10 = arith.constant 0 : index
    %10 = vector.load %arg5[%c0_9, %c0_10] : memref<1x8xf32, #tpu.memory_space<vmem>>, vector<1x8xf32>
    %11 = vector.broadcast %10 : vector<1x8xf32> to vector<8x8xf32>
    %12 = arith.addf %9, %11 : vector<8x8xf32>
    %c0_11 = arith.constant 0 : index
    %c0_12 = arith.constant 0 : index
    %13 = vector.load %arg6[%c0_11, %c0_12] : memref<8x8xf32, #tpu.memory_space<vmem>>, vector<8x8xf32>
    tpu.vector_store %arg6[%c0_11, %c0_12], %12 {strides = array<i32>} : memref<8x8xf32, #tpu.memory_space<vmem>>, vector<8x8xf32>,
    return
  }
  func.func @transform_0(%arg0: i32) -> (i32, i32) {
    %c0_i32 = arith.constant 0 : i32
    %c0_i32_0 = arith.constant 0 : i32
    return %arg0, %c0_i32 : i32, i32
  }
  func.func @transform_1(%arg0: i32) -> (i32, i32) {
    %c0_i32 = arith.constant 0 : i32
    %c0_i32_0 = arith.constant 0 : i32
    %c0_i32_1 = arith.constant 0 : i32
    return %c0_i32, %c0_i32_0 : i32, i32
  }
  func.func @transform_2(%arg0: i32) -> (i32, i32) {
    %c0_i32 = arith.constant 0 : i32
    %c0_i32_0 = arith.constant 0 : i32
    %c0_i32_1 = arith.constant 0 : i32
    return %c0_i32, %c0_i32_0 : i32, i32
  }
  func.func @transform_3(%arg0: i32) -> (i32, i32) {
    %c0_i32 = arith.constant 0 : i32
    %c0_i32_0 = arith.constant 0 : i32
    %c0_i32_1 = arith.constant 0 : i32
    return %c0_i32, %c0_i32_0 : i32, i32
  }
  func.func @transform_4(%arg0: i32) -> (i32, i32) {
    %c0_i32 = arith.constant 0 : i32
    %c0_i32_0 = arith.constant 0 : i32
    %c0_i32_1 = arith.constant 0 : i32
    return %c0_i32, %c0_i32_0 : i32, i32
  }
  func.func @transform_5(%arg0: i32) -> (i32, i32) {
    %c0_i32 = arith.constant 0 : i32
    %c0_i32_0 = arith.constant 0 : i32
    return %arg0, %c0_i32 : i32, i32
  }
}

</mosaic_0001>

<bundles_post_ra>
// kernel: simple_classifier_forward.1
= control target key start
LH: loop header
LB: loop body
LE: loop exit
PB: predicated region body
PF: predicated region fallthrough
CT: control target
= control target key end

     0   :  { %v313_v1 = vmov 0.0   ;;  %vm314_vm0 = vmmov 0   ;;  %vm33_vm1 = vcmask 261120   ;;  %s442_s0 = inlined_call_operand.vmem [shape: f32[8,32], index: 0, kind: input, shape index: {}]   ;;  %s443_s1 = inlined_call_operand.vmem [shape: f32[32,128], index: 1, kind: input, shape index: {}]   ;;  %s444_s2 = inlined_call_operand.vmem [shape: f32[1,128], index: 2, kind: input, shape index: {}]   ;;  %s445_s3 = inlined_call_operand.vmem [shape: f32[128,8], index: 3, kind: input, shape index: {}]   ;;  %s446_s4 = inlined_call_operand.vmem [shape: f32[1,8], index: 4, kind: input, shape index: {}]   ;;  %s447_s5 = inlined_call_operand.hbm [shape: f32[8,8], index: 5, kind: output, shape index: {}]  }
   0x1   :  { %v25_v0 = vld [vmem:[%s443_s1 + $0x18] sm:$0xff]  ;;  %242 = vmatprep.subr.mxu0 %v313_v1  ;;  %v24_v2 = vld [vmem:[%s443_s1 + $0x10] sm:$0xff]  ;;  %250 = vmatprep.mubr.msk.f32.mxu0 %vm314_vm0, %v313_v1  ;;  %v23_v5 = vld [vmem:[%s443_s1 + $0x8] sm:$0xff] }
   0x2   :  { %v123_v3 = vld [vmem:[%s445_s3 + $0x78] sm:$0xff]  ;;  %243 = vmatpush3.msra.mxu0 %v25_v0  ;;  %253 = vmatprep.subr.mxu1 %v313_v1  ;;  %v122_v4 = vld [vmem:[%s445_s3 + $0x70] sm:$0xff]  ;;  %v121_v6 = vld [vmem:[%s445_s3 + $0x68] sm:$0xff] }
   0x3   :  { %244 = vmatprep.subr.mxu0 %v313_v1  ;;  %254 = vmatpush3.msra.mxu1 %v123_v3  ;;  %v22_v7 = vld [vmem:[%s443_s1] sm:$0xff] }
   0x4   :  { %245 = vmatpush3.msra.mxu0 %v24_v2  ;;  %255 = vmatprep.subr.mxu1 %v313_v1  ;;  %v21_v8 = vld [vmem:[%s442_s0] sm:$0xff] }
   0x5   :  { %246 = vmatprep.subr.mxu0 %v313_v1  ;;  %256 = vmatpush3.msra.mxu1 %v122_v4  ;;  %v120_v9 = vld [vmem:[%s445_s3 + $0x60] sm:$0xff] }
   0x6   :  { %247 = vmatpush3.msra.mxu0 %v23_v5  ;;  %257 = vmatprep.subr.mxu1 %v313_v1 }
   0x7   :  { %10 = vsyncpa [#allocation3], 0  ;;  %248 = vmatprep.subr.mxu0 %v313_v1  ;;  %258 = vmatpush3.msra.mxu1 %v121_v6  ;;  %v119_v10 = vld [vmem:[%s445_s3 + $0x58] sm:$0xff]  ;;  %v118_v11 = vld [vmem:[%s445_s3 + $0x50] sm:$0xff]  ;;  %s315_s11 = smov [#allocation2]   ;;  %vm201_vm2 = vcmask 64512  }
   0x8   :  { %249 = vmatpush3.msra.mxu0 %v22_v7  ;;  %259 = vmatprep.subr.mxu1 %v313_v1  ;;  %v117_v12 = vld [vmem:[%s445_s3 + $0x48] sm:$0xff]  ;;  %v116_v13 = vld [vmem:[%s445_s3 + $0x40] sm:$0xff]  ;;  %v115_v14 = vld [vmem:[%s445_s3 + $0x38] sm:$0xff]  ;;  %s209_s0 = sshll.u32 %s315_s11, 4  ;;  %s210_s0 = int_to_ptr.vmem [resolvable:$true] %s209_s0 }
   0x9   :  { %251 = vmatmul.mubr.msk.f32.vlgmr.msra.gmra.mxu0 %vm33_vm1, %v21_v8  ;;  %260 = vmatpush3.msra.mxu1 %v120_v9  ;;  %v114_v15 = vld [vmem:[%s445_s3 + $0x30] sm:$0xff]  ;;  %v113_v16 = vld [vmem:[%s445_s3 + $0x28] sm:$0xff]  ;;  %v112_v17 = vld [vmem:[%s445_s3 + $0x20] sm:$0xff]  ;;  %p296_p1 = scmp.lt.s32.totalorder %s210_s0, %s210_s0 }
   0xa   :  { %261 = vmatprep.subr.mxu1 %v313_v1  ;;  %285 = vmatprep.mubr.msk.f32.mxu1 %vm314_vm0, %v313_v1  ;;  %v111_v18 = vld [vmem:[%s445_s3 + $0x18] sm:$0xff]  ;;  %v110_v19 = vld [vmem:[%s445_s3 + $0x10] sm:$0xff]  ;;  %v109_v20 = vld [vmem:[%s445_s3 + $0x8] sm:$0xff] }
   0xb   :  { %262 = vmatpush3.msra.mxu1 %v119_v10  ;;  %v108_v21 = vld [vmem:[%s445_s3] sm:$0xff]  ;;  %s291_s3 = scalar_lea.vmem %s210_s0, 128 }
   0xc   :  { %263 = vmatprep.subr.mxu1 %v313_v1  ;;  %v217_v22 = vld [vmem:[%s444_s2] ss:$0 sm:$0xff]  ;;  %p292_p0 = scmp.ne.s32.totalorder %s210_s0, %s291_s3  ;;  %p297_p2 = scmp.lt.s32.totalorder %s291_s3, %s291_s3 }
   0xd   :  { %264 = vmatpush3.msra.mxu1 %v118_v11  ;;  %v219_v27 = vld [vmem:[%s446_s4] ss:$0 sm:$0xff] }
   0xe   :  { %265 = vmatprep.subr.mxu1 %v313_v1  ;;  %p298_p3 = por %p297_p2, %p296_p1 }
   0xf   :  { %266 = vmatpush3.msra.mxu1 %v117_v12 }
  0x10   :  { %267 = vmatprep.subr.mxu1 %v313_v1  ;;  %p299_p4 = pnand %p298_p3, %p292_p0 }
  0x11   :  { %268 = vmatpush3.msra.mxu1 %v116_v13 }
  0x12   :  { %269 = vmatprep.subr.mxu1 %v313_v1 }
  0x13   :  { %270 = vmatpush3.msra.mxu1 %v115_v14 }
  0x14   :  { %271 = vmatprep.subr.mxu1 %v313_v1 }
  0x15   :  { %272 = vmatpush3.msra.mxu1 %v114_v15 }
  0x16   :  { %273 = vmatprep.subr.mxu1 %v313_v1 }
  0x17   :  { %274 = vmatpush3.msra.mxu1 %v113_v16 }
  0x18   :  { %275 = vmatprep.subr.mxu1 %v313_v1 }
  0x19   :  { %276 = vmatpush3.msra.mxu1 %v112_v17 }
  0x1a   :  { %277 = vmatprep.subr.mxu1 %v313_v1 }
  0x1b   :  { %278 = vmatpush3.msra.mxu1 %v111_v18 }
  0x1c   :  { %279 = vmatprep.subr.mxu1 %v313_v1 }
  0x1d   :  { %280 = vmatpush3.msra.mxu1 %v110_v19 }
  0x1e   :  { %281 = vmatprep.subr.mxu1 %v313_v1 }
  0x1f   :  { %282 = vmatpush3.msra.mxu1 %v109_v20 }
  0x20   :  { %283 = vmatprep.subr.mxu1 %v313_v1 }
  0x21   :  { %284 = vmatpush3.msra.mxu1 %v108_v21 }
  0xc9   :  { %v103_v23 = vpop.f32.mrf.mxu0 }
  0xca   :  { %v104_v24 = vadd.f32 %v217_v22, %v103_v23 }
  0xcb   :  { %v252_v25 = vpop.f32.mrf.mxu0 }
  0xcc   :  { %v107_v26 = vmax.f32 %v104_v24, 0.0 }
  0xce   :  { %286 = vmatmul.mubr.f32.vlgmr.msra.gmra.mxu1 %v107_v26 }
 0x18e   :  { %v197_v28 = vpop.f32.mrf.mxu1 }
 0x18f   :  { %v198_v29 = vadd.f32 %v219_v27, %v197_v28 }
 0x190   :  { %v287_v30 = vpop.f32.mrf.mxu1 }
 0x191   :  { %202 = vst.msk [vmem:[#allocation2] sm:$0xff] %vm201_vm2, %v198_v29 }
 0x192   :  { %302 = shalt.err (!%p299_p4)
}
 0x193   :  { %212 = dma.vmem_to_hbm [thread:$0]  %s210_s0, 128, %s447_s5, [#allocation3]  }
 0x194   :  { %311 = dma.done.wait [#allocation3], 128  }
 0x195   :  { %312 = vsyncadd [#allocation3], 4294967168 }
 0x196   :  { %216 = vsyncpa [#allocation3], 1 }

</bundles_post_ra>
